<compile_context>
chip_gen: v7x
topology: tpu7x:2x2x1
jax: 0.10.0
libtpu: 0.0.40
codegen_flags: <defaults>
</compile_context>

<pallas_src>
import jax
import jax.numpy as jnp
import numpy as np
from jax.experimental import pallas as pl
from jax.experimental.pallas import tpu as pltpu


def _make_factor(size: int, offset=None) -> jnp.ndarray:
    """Deterministic 'parameter' of the module (same as __init__)."""
    xx, yy = np.meshgrid(np.arange(0, size), np.arange(0, size))  # 'xy' indexing
    if offset is None:
        offset_x = offset_y = size // 2
    else:
        offset_x, offset_y = (offset, offset) if isinstance(offset, int) else offset
    factor = -(np.power(xx - offset_x, 2) + np.power(yy - offset_y, 2)) / 2.0
    return jnp.asarray(factor, dtype=jnp.float32)


def _kernelgen_kernel(scalars_ref, factor_ref, out_ref):
    # scalars_ref: SMEM (2,) f32 -> [inv_pow2, max(factor) * inv_pow2]
    # factor_ref / out_ref: VMEM lane-dense tiles (rows, 128) (or (S, S) fallback)
    inv_pow2 = scalars_ref[0]
    shift = scalars_ref[1]
    # kernel / kernel.max() == exp((factor - max_factor) / pow2)
    out_ref[...] = jnp.exp(factor_ref[...] * inv_pow2 - shift)


def _choose_row_tile(rows: int) -> int:
    """Largest convenient row tile: full array if small, else a multiple of 8."""
    if rows <= 1024:
        return rows
    for t in (1024, 512, 256, 128, 64, 32, 16, 8):
        if rows % t == 0:
            return t
    return rows  # irregular row count: fall back to a single full block


def kernel_generator(theta: jnp.ndarray, factor: jnp.ndarray) -> jnp.ndarray:
    """theta: scalar () or (1,) float32; factor: (S, S) float32."""
    S = factor.shape[0]
    factor = factor.astype(jnp.float32)
    theta = jnp.asarray(theta, jnp.float32).reshape(())

    # Hoisted scalar math (runs once per call as trivial XLA scalar ops).
    pow2 = (theta * jnp.float32(S)) ** 2
    inv_pow2 = 1.0 / pow2
    shift = jnp.max(factor) * inv_pow2            # max(factor) is a static constant
    scalars = jnp.stack([inv_pow2, shift]).astype(jnp.float32)   # (2,) -> SMEM

    # Lane-dense working layout.
    total = S * S
    if total % 128 == 0:
        work_shape = (total // 128, 128)
    else:
        work_shape = (S, S)                       # fallback: full-array block is legal
    work = factor.reshape(work_shape)

    tile_rows = _choose_row_tile(work_shape[0])
    grid = (work_shape[0] // tile_rows,)
    block = (tile_rows, work_shape[1])

    out = pl.pallas_call(
        _kernelgen_kernel,
        out_shape=jax.ShapeDtypeStruct(work_shape, jnp.float32),
        grid=grid,
        in_specs=[
            pl.BlockSpec(memory_space=pltpu.MemorySpace.SMEM),   # scalars, whole array
            pl.BlockSpec(block, lambda i: (i, 0)),               # factor row tile
        ],
        out_specs=pl.BlockSpec(block, lambda i: (i, 0)),
        compiler_params=pltpu.CompilerParams(
            dimension_semantics=("parallel",),
        ),
    )(scalars, work)

    return out.reshape(S, S)


def kernel_generator_ref(theta: jnp.ndarray, factor: jnp.ndarray) -> jnp.ndarray:
    """Pure-JAX reference (mirrors the PyTorch forward exactly)."""
    S = factor.shape[0]
    pow2 = (jnp.asarray(theta, jnp.float32) * S) ** 2
    k = 1.0 / (2.0 * np.pi * pow2) * jnp.exp(factor / pow2)
    return k / jnp.max(k)


if __name__ == "__main__":
    size = 16
    factor = _make_factor(size)

    key = jax.random.PRNGKey(0)
    # theta is a positive scalar "bandwidth" parameter
    theta = jax.random.uniform(key, (), dtype=jnp.float32, minval=0.5, maxval=1.5)

    out = kernel_generator(theta, factor)
    out = jax.block_until_ready(out)

    ref = kernel_generator_ref(theta, factor)
    np.testing.assert_allclose(np.asarray(out), np.asarray(ref), rtol=1e-5, atol=1e-6)

    print("KERNEL_OK")
</pallas_src>

<mosaic_0001>
module attributes {stable_mosaic.version = 11 : i64} {
  func.func @_kernelgen_kernel(%arg0: i32, %arg1: memref<2xf32, #tpu.memory_space<smem>>, %arg2: memref<2x128xf32, #tpu.memory_space<vmem>>, %arg3: memref<2x128xf32, #tpu.memory_space<vmem>>) attributes {dimension_semantics = [#tpu.dimension_semantics<parallel>], iteration_bounds = array<i64: 1>, scalar_prefetch = 0 : i64, scratch_operands = 0 : i64, tpu.core_type = #tpu.core_type<tc>, window_params = [{transform_indices = @transform_0, window_bounds = array<i64: 2>}, {transform_indices = @transform_1, window_bounds = array<i64: 2, 128>}, {transform_indices = @transform_2, window_bounds = array<i64: 2, 128>}]} {
    %c0 = arith.constant 0 : index
    %0 = memref.load %arg1[%c0] : memref<2xf32, #tpu.memory_space<smem>>
    %c1 = arith.constant 1 : index
    %1 = memref.load %arg1[%c1] : memref<2xf32, #tpu.memory_space<smem>>
    %c0_0 = arith.constant 0 : index
    %c0_1 = arith.constant 0 : index
    %2 = vector.load %arg2[%c0_0, %c0_1] : memref<2x128xf32, #tpu.memory_space<vmem>>, vector<2x128xf32>
    %3 = vector.broadcast %0 : f32 to vector<2x128xf32>
    %4 = arith.mulf %2, %3 : vector<2x128xf32>
    %5 = vector.broadcast %1 : f32 to vector<2x128xf32>
    %6 = arith.subf %4, %5 : vector<2x128xf32>
    %7 = math.exp %6 : vector<2x128xf32>
    %c0_2 = arith.constant 0 : index
    %c0_3 = arith.constant 0 : index
    %8 = vector.load %arg3[%c0_2, %c0_3] : memref<2x128xf32, #tpu.memory_space<vmem>>, vector<2x128xf32>
    tpu.vector_store %arg3[%c0_2, %c0_3], %7 {strides = array<i32>} : memref<2x128xf32, #tpu.memory_space<vmem>>, vector<2x128xf32>,
    return
  }
  func.func @transform_0(%arg0: i32) -> i32 {
    %c0_i32 = arith.constant 0 : i32
    %c0_i32_0 = arith.constant 0 : i32
    return %c0_i32 : i32
  }
  func.func @transform_1(%arg0: i32) -> (i32, i32) {
    %c0_i32 = arith.constant 0 : i32
    %c0_i32_0 = arith.constant 0 : i32
    return %arg0, %c0_i32 : i32, i32
  }
  func.func @transform_2(%arg0: i32) -> (i32, i32) {
    %c0_i32 = arith.constant 0 : i32
    %c0_i32_0 = arith.constant 0 : i32
    return %arg0, %c0_i32 : i32, i32
  }
}

</mosaic_0001>

<bundles_post_ra>
// kernel: tpu_custom_call.1
= control target key start
LH: loop header
LB: loop body
LE: loop exit
PB: predicated region body
PF: predicated region fallthrough
CT: control target
= control target key end

     0   :  { %7 = vsyncpa [#allocation4], 0  ;;  %s133_s0 = inlined_call_operand.hbm [shape: f32[2], index: 0, kind: input, shape index: {}]   ;;  %s134_s1 = inlined_call_operand.vmem [shape: f32[2,128], index: 1, kind: input, shape index: {}]   ;;  %s135_s2 = inlined_call_operand.hbm [shape: f32[2,128], index: 2, kind: output, shape index: {}]  }
   0x1   :  { %8 = vsyncpa [#allocation3], 0  ;;  %s53_s11 = scalar_lea.hbm %s133_s0, 16 }
   0x2   :  { %p54_p0 = scmp.ne.s32.totalorder %s133_s0, %s53_s11  ;;  %p57_p1 = scmp.lt.u32.totalorder %s53_s11, %s133_s0 }
   0x4   :  { %p59_p2 = pnand %p57_p1, %p54_p0 }
   0x6   :  { %62 = shalt.err (!%p59_p2)
}
   0x7   :  { %s89_s16 = smov [#allocation2]  }
   0x8   :  { %16 = dma.hbm_to_smem %s133_s0, 16, %s89_s16, [#allocation4]  }
   0x9   :  { %85 = dma.done.wait [#allocation4], 16  }
   0xa   :  { %86 = vsyncadd [#allocation4], 4294967280 }
   0xb   :  { %22 = sfence }
   0xc   :  { %s23_s19 = sld [smem:[#allocation2]]  ;;  %s48_s20 = sld [smem:[#allocation2 + $0x1]]  ;;  %v25_v0 = vld [vmem:[%s134_s1] sm:$0x3] }
   0xd   :  { %s90_s23 = smov [#allocation5]  }
   0xe   :  { %s39_s24 = sshll.u32 %s90_s23, 4  ;;  %s40_s24 = int_to_ptr.vmem [resolvable:$true] %s39_s24 }
   0xf   :  { %s63_s0 = scalar_lea.vmem %s40_s24, 32  ;;  %p68_p4 = scmp.lt.s32.totalorder %s40_s24, %s40_s24 }
  0x10   :  { %p64_p3 = scmp.ne.s32.totalorder %s40_s24, %s63_s0  ;;  %p69_p5 = scmp.lt.s32.totalorder %s63_s0, %s63_s0 }
  0x12   :  { %v26_v1 = vstv %s23_s19  ;;  %v28_v2 = vstv %s48_s20  ;;  %p70_p6 = por %p69_p5, %p68_p4 }
  0x13   :  { %v27_v3 = vmul.f32 %v26_v1, %v25_v0 }
  0x14   :  { %p71_p7 = pnand %p70_p6, %p64_p3 }
  0x15   :  { %v29_v4 = vsub.f32 %v27_v3, %v28_v2 }
  0x17   :  { %v30_v5 = vmul.f32 1.442695, %v29_v4 }
  0x19   :  { %51 = vpow2.f32 %v30_v5 }
  0x23   :  { %v52_v6 = vpop.eup %51 }
  0x24   :  { %32 = vst [vmem:[#allocation5] sm:$0x3] %v52_v6 }
  0x25   :  { %74 = shalt.err (!%p71_p7)
}
  0x26   :  { %s75_s26 = scalar_lea.hbm %s135_s2, 32 }
  0x27   :  { %p76_p8 = scmp.ne.s32.totalorder %s135_s2, %s75_s26  ;;  %p79_p9 = scmp.lt.u32.totalorder %s75_s26, %s135_s2 }
  0x29   :  { %p81_p10 = pnand %p79_p9, %p76_p8 }
  0x2b   :  { %84 = shalt.err (!%p81_p10)
}
  0x2c   :  { %42 = dma.vmem_to_hbm [thread:$0]  %s40_s24, 32, %s135_s2, [#allocation3]  }
  0x2d   :  { %87 = dma.done.wait [#allocation3], 32  }
  0x2e   :  { %88 = vsyncadd [#allocation3], 4294967264 }
  0x2f   :  { %46 = vsyncpa [#allocation3], 1 }
  0x30   :  { %47 = vsyncpa [#allocation4], 1 }

</bundles_post_ra>
